<compile_context>
chip_gen: v7x
topology: tpu7x:2x2x1
jax: 0.10.0
libtpu: 0.0.40
codegen_flags: <defaults>
</compile_context>

<pallas_src>
import jax
import jax.numpy as jnp
from jax.experimental import pallas as pl
from jax.experimental.pallas import tpu as pltpu


LANE = 128          # TPU lane width
TN_TARGET = 2048    # node-tile target (multiple of 128)


def _cdiv(a, b):
    return (a + b - 1) // b


def _round_up(a, m):
    return _cdiv(a, m) * m


def _vmem_capacity_bytes():
    """Physical per-core VMEM (128 MiB on v5e/v6e, 64 MiB on v7x)."""
    try:
        return int(pltpu.get_tpu_info().vmem_capacity_bytes)
    except Exception:
        return 64 * 1024 * 1024   # conservative (v7x) default


def _select_tiles(c_in, c_out, n_cols, x_item, w_item, o_item, budget):
    """Pick (tk, tn).

    tk == c_in means W stays fully resident (no K tiling).  K-tile candidates
    are 128-multiples that divide C_in exactly, so the reduction boundary is
    exact and no Pallas boundary padding leaks into the accumulator.
    tn is the largest 128-multiple node tile whose per-step footprint
    (double-buffered x/out tiles + worst-case double-buffered W + f32 acc)
    fits the VMEM budget.
    """
    tn_cap = max(LANE, min(TN_TARGET, _round_up(max(n_cols, 1), LANE)))
    tk_opts = [c_in] + [t for t in range((c_in // LANE) * LANE, 0, -LANE)
                        if t != c_in and c_in % t == 0]
    for tk in tk_opts:
        fixed = 2 * c_out * tk * w_item + 2 * c_out * max(o_item, 4)   # W + bias
        per_col = 2 * tk * x_item + 2 * c_out * o_item + c_out * 4     # x, out, acc
        avail = budget - fixed
        if per_col <= 0 or avail < per_col * LANE:
            continue
        tn = min(tn_cap, (avail // per_col) // LANE * LANE)
        if tn >= LANE:
            return tk, int(tn)
    # Nothing fits comfortably: fall back to the smallest tiles and rely on the
    # explicit vmem_limit_bytes headroom.
    return tk_opts[-1], LANE


def _make_kernel(k_axis):
    def kernel(w_ref, b_ref, x_ref, o_ref, acc_ref):
        # w_ref: (C_out, tk)   resident / K-tiled weight
        # b_ref: (C_out, 1)    resident bias
        # x_ref: (tk, tn)      lane-dense node tile (batch dim squeezed away)
        # o_ref: (C_out, tn)   lane-dense output tile
        # acc_ref: (C_out, tn) f32 accumulator (only needed when C_in is tiled)
        @pl.when(pl.program_id(k_axis) == 0)
        def _():
            acc_ref[...] = jnp.zeros_like(acc_ref)

        acc_ref[...] += jnp.dot(w_ref[...], x_ref[...],
                                preferred_element_type=jnp.float32)

        @pl.when(pl.program_id(k_axis) == pl.num_programs(k_axis) - 1)
        def _():
            o_ref[...] = (acc_ref[...] + b_ref[...]).astype(o_ref.dtype)

    return kernel


def graph_linear(x, W, b):
    """x: [B, C_in, N], W: [C_out, C_in], b: [C_out] -> [B, C_out, N]."""
    B, C_in, N = x.shape
    C_out = W.shape[0]
    out_dtype = x.dtype
    b2d = b.reshape(C_out, 1)

    x_item = x.dtype.itemsize
    w_item = W.dtype.itemsize
    o_item = jnp.dtype(out_dtype).itemsize

    cap = _vmem_capacity_bytes()
    budget = max(cap // 2, 16 * 1024 * 1024)      # tile sizing budget
    vmem_limit = int(cap * 3 // 4)                # explicit scoped-VMEM limit

    # Native-layout path whenever the node axis is at least one lane wide;
    # otherwise fold the batch into the lane axis (single transpose copy, only
    # for tiny graphs where lane density would otherwise be terrible).
    batched = N >= LANE
    if batched:
        n_cols = N
        x_in = x
    else:
        n_cols = B * N
        x_in = jnp.transpose(x, (1, 0, 2)).reshape(C_in, n_cols)

    tk, tn = _select_tiles(C_in, C_out, n_cols, x_item, w_item, o_item, budget)
    grid_k = _cdiv(C_in, tk)

    if n_cols <= tn:
        tn = n_cols                      # single full-extent tile, no padding
    grid_n = _cdiv(n_cols, tn)

    # v7x megacore: make sure there are >= 2 parallel tiles when possible.
    n_parallel_other = B if batched else 1
    if n_parallel_other * grid_n < 2 and n_cols > LANE:
        tn = _round_up(_cdiv(n_cols, 2), LANE)
        grid_n = _cdiv(n_cols, tn)

    cost = pl.CostEstimate(
        flops=2 * C_out * C_in * B * N,
        bytes_accessed=(x.size * x_item + B * C_out * N * o_item
                        + W.size * w_item + b.size * b.dtype.itemsize),
        transcendentals=0,
    )

    def _call(single_buffer_resident):
        def maybe_resident(shape, index_map, resident):
            if single_buffer_resident and resident:
                return pl.BlockSpec(shape, index_map,
                                    pipeline_mode=pl.Buffered(1))
            return pl.BlockSpec(shape, index_map)

        if batched:
            grid = (B, grid_n, grid_k)
            k_axis = 2
            w_spec = maybe_resident((C_out, tk), lambda bb, ni, ki: (0, ki),
                                    resident=(grid_k == 1))
            b_spec = maybe_resident((C_out, 1), lambda bb, ni, ki: (0, 0),
                                    resident=True)
            x_spec = pl.BlockSpec((pl.Squeezed(), tk, tn),
                                  lambda bb, ni, ki: (bb, ki, ni))
            o_spec = pl.BlockSpec((pl.Squeezed(), C_out, tn),
                                  lambda bb, ni, ki: (bb, 0, ni))
            out_shape = jax.ShapeDtypeStruct((B, C_out, N), out_dtype)
            semantics = ("parallel", "parallel", "arbitrary")
        else:
            grid = (grid_n, grid_k)
            k_axis = 1
            w_spec = maybe_resident((C_out, tk), lambda ni, ki: (0, ki),
                                    resident=(grid_k == 1))
            b_spec = maybe_resident((C_out, 1), lambda ni, ki: (0, 0),
                                    resident=True)
            x_spec = pl.BlockSpec((tk, tn), lambda ni, ki: (ki, ni))
            o_spec = pl.BlockSpec((C_out, tn), lambda ni, ki: (0, ni))
            out_shape = jax.ShapeDtypeStruct((C_out, n_cols), out_dtype)
            semantics = ("parallel", "arbitrary")

        return pl.pallas_call(
            _make_kernel(k_axis),
            out_shape=out_shape,
            grid_spec=pltpu.PrefetchScalarGridSpec(
                num_scalar_prefetch=0,
                grid=grid,
                in_specs=[w_spec, b_spec, x_spec],
                out_specs=o_spec,
                scratch_shapes=[pltpu.VMEM((C_out, tn), jnp.float32)],
            ),
            compiler_params=pltpu.CompilerParams(
                dimension_semantics=semantics,
                vmem_limit_bytes=vmem_limit,
            ),
            cost_estimate=cost,
        )(W, b2d, x_in)

    try:
        out = _call(True)
    except Exception:
        # pl.Buffered(1) (single-buffered resident weights/bias) may be
        # unsupported on some jax versions; retry with default double buffering.
        out = _call(False)

    if batched:
        return out
    out = out.reshape(C_out, B, N)
    return jnp.transpose(out, (1, 0, 2))


if __name__ == "__main__":
    key = jax.random.PRNGKey(0)
    k_w, k_b, k_x, k_x2 = jax.random.split(key, 4)

    # Small shapes consistent with the module's forward: x = [B, C_in, N].
    B, C_in, C_out, N = 2, 4, 8, 16

    # Deterministic init mirroring reset_parameters(): uniform(-w_stdv, w_stdv).
    w_stdv = 1.0 / (C_in * C_out)
    W = jax.random.uniform(k_w, (C_out, C_in), jnp.float32, -w_stdv, w_stdv)
    b = jax.random.uniform(k_b, (C_out,), jnp.float32, -w_stdv, w_stdv)

    # 1) Tiny-graph fallback path (N < 128): batch collapsed into lanes.
    x_small = jax.random.normal(k_x, (B, C_in, N), jnp.float32)
    out_small = jax.block_until_ready(graph_linear(x_small, W, b))
    ref_small = jnp.matmul(W[None, :, :], x_small) + b[None, :, None]
    assert out_small.shape == (B, C_out, N)
    assert jnp.allclose(out_small, ref_small, atol=1e-5, rtol=1e-5)

    # 2) Main path (N >= 128): native [B, C_in, N] layout, no wrapper transposes.
    N_big = 256
    x_big = jax.random.normal(k_x2, (B, C_in, N_big), jnp.float32)
    out_big = jax.block_until_ready(graph_linear(x_big, W, b))
    ref_big = jnp.matmul(W[None, :, :], x_big) + b[None, :, None]
    assert out_big.shape == (B, C_out, N_big)
    assert jnp.allclose(out_big, ref_big, atol=1e-5, rtol=1e-5)

    print("KERNEL_OK")
</pallas_src>

<mosaic_0001>
module attributes {stable_mosaic.version = 11 : i64} {
  func.func @kernel(%arg0: i32, %arg1: i32, %arg2: memref<8x4xf32, #tpu.memory_space<vmem>>, %arg3: memref<8x1xf32, #tpu.memory_space<vmem>>, %arg4: memref<4x32xf32, #tpu.memory_space<vmem>>, %arg5: memref<8x32xf32, #tpu.memory_space<vmem>>, %arg6: memref<8x32xf32, #tpu.memory_space<vmem>>) attributes {dimension_semantics = [#tpu.dimension_semantics<parallel>, #tpu.dimension_semantics<arbitrary>], iteration_bounds = array<i64: 1, 1>, scalar_prefetch = 0 : i64, scratch_operands = 1 : i64, tpu.core_type = #tpu.core_type<tc>, window_params = [{pipeline_mode = #tpu.pipeline_mode<synchronous>, transform_indices = @transform_0, window_bounds = array<i64: 8, 4>}, {pipeline_mode = #tpu.pipeline_mode<synchronous>, transform_indices = @transform_1, window_bounds = array<i64: 8, 1>}, {transform_indices = @transform_2, window_bounds = array<i64: 4, 32>}, {transform_indices = @transform_3, window_bounds = array<i64: 8, 32>}]} {
    %c0_i32 = arith.constant 0 : i32
    %0 = arith.cmpi eq, %arg1, %c0_i32 : i32
    %1 = arith.extui %0 : i1 to i32
    %c0_i32_0 = arith.constant 0 : i32
    %2 = arith.cmpi ne, %1, %c0_i32_0 : i32
    scf.if %2 {
      %cst_10 = arith.constant 0.000000e+00 : f32
      %12 = vector.broadcast %cst_10 : f32 to vector<8x32xf32>
      %c0_11 = arith.constant 0 : index
      %c0_12 = arith.constant 0 : index
      %13 = vector.load %arg6[%c0_11, %c0_12] : memref<8x32xf32, #tpu.memory_space<vmem>>, vector<8x32xf32>
      tpu.vector_store %arg6[%c0_11, %c0_12], %12 {strides = array<i32>} : memref<8x32xf32, #tpu.memory_space<vmem>>, vector<8x32xf32>,
    } else {
    }
    %c0 = arith.constant 0 : index
    %c0_1 = arith.constant 0 : index
    %3 = vector.load %arg6[%c0, %c0_1] : memref<8x32xf32, #tpu.memory_space<vmem>>, vector<8x32xf32>
    %c0_2 = arith.constant 0 : index
    %c0_3 = arith.constant 0 : index
    %4 = vector.load %arg2[%c0_2, %c0_3] : memref<8x4xf32, #tpu.memory_space<vmem>>, vector<8x4xf32>
    %c0_4 = arith.constant 0 : index
    %c0_5 = arith.constant 0 : index
    %5 = vector.load %arg4[%c0_4, %c0_5] : memref<4x32xf32, #tpu.memory_space<vmem>>, vector<4x32xf32>
    %cst = arith.constant dense<0.000000e+00> : vector<8x32xf32>
    %6 = tpu.matmul %4, %5, %cst {dimension_numbers = #tpu.dot_dimension_numbers<[1], [0], [0], [1], [0, 0, 1, 1], [], []>} : vector<8x4xf32>, vector<4x32xf32>, vector<8x32xf32> -> vector<8x32xf32>
    %7 = arith.addf %3, %6 : vector<8x32xf32>
    %c0_6 = arith.constant 0 : index
    %c0_7 = arith.constant 0 : index
    %8 = vector.load %arg6[%c0_6, %c0_7] : memref<8x32xf32, #tpu.memory_space<vmem>>, vector<8x32xf32>
    tpu.vector_store %arg6[%c0_6, %c0_7], %7 {strides = array<i32>} : memref<8x32xf32, #tpu.memory_space<vmem>>, vector<8x32xf32>,
    %c0_i32_8 = arith.constant 0 : i32
    %9 = arith.cmpi eq, %arg1, %c0_i32_8 : i32
    %10 = arith.extui %9 : i1 to i32
    %c0_i32_9 = arith.constant 0 : i32
    %11 = arith.cmpi ne, %10, %c0_i32_9 : i32
    scf.if %11 {
      %c0_10 = arith.constant 0 : index
      %c0_11 = arith.constant 0 : index
      %12 = vector.load %arg6[%c0_10, %c0_11] : memref<8x32xf32, #tpu.memory_space<vmem>>, vector<8x32xf32>
      %c0_12 = arith.constant 0 : index
      %c0_13 = arith.constant 0 : index
      %13 = vector.load %arg3[%c0_12, %c0_13] : memref<8x1xf32, #tpu.memory_space<vmem>>, vector<8x1xf32>
      %14 = vector.broadcast %13 : vector<8x1xf32> to vector<8x32xf32>
      %15 = arith.addf %12, %14 : vector<8x32xf32>
      %c0_14 = arith.constant 0 : index
      %c0_15 = arith.constant 0 : index
      %16 = vector.load %arg5[%c0_14, %c0_15] : memref<8x32xf32, #tpu.memory_space<vmem>>, vector<8x32xf32>
      tpu.vector_store %arg5[%c0_14, %c0_15], %15 {strides = array<i32>} : memref<8x32xf32, #tpu.memory_space<vmem>>, vector<8x32xf32>,
    } else {
    }
    return
  }
  func.func @transform_0(%arg0: i32, %arg1: i32) -> (i32, i32) {
    %c0_i32 = arith.constant 0 : i32
    %c0_i32_0 = arith.constant 0 : i32
    return %c0_i32, %arg1 : i32, i32
  }
  func.func @transform_1(%arg0: i32, %arg1: i32) -> (i32, i32) {
    %c0_i32 = arith.constant 0 : i32
    %c0_i32_0 = arith.constant 0 : i32
    %c0_i32_1 = arith.constant 0 : i32
    return %c0_i32, %c0_i32_0 : i32, i32
  }
  func.func @transform_2(%arg0: i32, %arg1: i32) -> (i32, i32) {
    %c0_i32 = arith.constant 0 : i32
    return %arg1, %arg0 : i32, i32
  }
  func.func @transform_3(%arg0: i32, %arg1: i32) -> (i32, i32) {
    %c0_i32 = arith.constant 0 : i32
    %c0_i32_0 = arith.constant 0 : i32
    return %c0_i32, %arg0 : i32, i32
  }
}

module attributes {stable_mosaic.version = 11 : i64} {
  func.func @kernel(%arg0: i32, %arg1: i32, %arg2: memref<8x4xf32, #tpu.memory_space<vmem>>, %arg3: memref<8x1xf32, #tpu.memory_space<vmem>>, %arg4: memref<4x32xf32, #tpu.memory_space<vmem>>, %arg5: memref<8x32xf32, #tpu.memory_space<vmem>>, %arg6: memref<8x32xf32, #tpu.memory_space<vmem>>) attributes {dimension_semantics = [#tpu.dimension_semantics<parallel>, #tpu.dimension_semantics<arbitrary>], iteration_bounds = array<i64: 1, 1>, scalar_prefetch = 0 : i64, scratch_operands = 1 : i64, tpu.core_type = #tpu.core_type<tc>, window_params = [{transform_indices = @transform_0, window_bounds = array<i64: 8, 4>}, {pipeline_mode = #tpu.pipeline_mode<synchronous>, transform_indices = @transform_1, window_bounds = array<i64: 8, 1>}, {transform_indices = @transform_2, window_bounds = array<i64: 4, 32>}, {transform_indices = @transform_3, window_bounds = array<i64: 8, 32>}]} {
    %c0_i32 = arith.constant 0 : i32
    %0 = arith.cmpi eq, %arg1, %c0_i32 : i32
    %1 = arith.extui %0 : i1 to i32
    %c0_i32_0 = arith.constant 0 : i32
    %2 = arith.cmpi ne, %1, %c0_i32_0 : i32
    scf.if %2 {
      %cst_10 = arith.constant 0.000000e+00 : f32
      %12 = vector.broadcast %cst_10 : f32 to vector<8x32xf32>
      %c0_11 = arith.constant 0 : index
      %c0_12 = arith.constant 0 : index
      %13 = vector.load %arg6[%c0_11, %c0_12] : memref<8x32xf32, #tpu.memory_space<vmem>>, vector<8x32xf32>
      tpu.vector_store %arg6[%c0_11, %c0_12], %12 {strides = array<i32>} : memref<8x32xf32, #tpu.memory_space<vmem>>, vector<8x32xf32>,
    } else {
    }
    %c0 = arith.constant 0 : index
    %c0_1 = arith.constant 0 : index
    %3 = vector.load %arg6[%c0, %c0_1] : memref<8x32xf32, #tpu.memory_space<vmem>>, vector<8x32xf32>
    %c0_2 = arith.constant 0 : index
    %c0_3 = arith.constant 0 : index
    %4 = vector.load %arg2[%c0_2, %c0_3] : memref<8x4xf32, #tpu.memory_space<vmem>>, vector<8x4xf32>
    %c0_4 = arith.constant 0 : index
    %c0_5 = arith.constant 0 : index
    %5 = vector.load %arg4[%c0_4, %c0_5] : memref<4x32xf32, #tpu.memory_space<vmem>>, vector<4x32xf32>
    %cst = arith.constant dense<0.000000e+00> : vector<8x32xf32>
    %6 = tpu.matmul %4, %5, %cst {dimension_numbers = #tpu.dot_dimension_numbers<[1], [0], [0], [1], [0, 0, 1, 1], [], []>} : vector<8x4xf32>, vector<4x32xf32>, vector<8x32xf32> -> vector<8x32xf32>
    %7 = arith.addf %3, %6 : vector<8x32xf32>
    %c0_6 = arith.constant 0 : index
    %c0_7 = arith.constant 0 : index
    %8 = vector.load %arg6[%c0_6, %c0_7] : memref<8x32xf32, #tpu.memory_space<vmem>>, vector<8x32xf32>
    tpu.vector_store %arg6[%c0_6, %c0_7], %7 {strides = array<i32>} : memref<8x32xf32, #tpu.memory_space<vmem>>, vector<8x32xf32>,
    %c0_i32_8 = arith.constant 0 : i32
    %9 = arith.cmpi eq, %arg1, %c0_i32_8 : i32
    %10 = arith.extui %9 : i1 to i32
    %c0_i32_9 = arith.constant 0 : i32
    %11 = arith.cmpi ne, %10, %c0_i32_9 : i32
    scf.if %11 {
      %c0_10 = arith.constant 0 : index
      %c0_11 = arith.constant 0 : index
      %12 = vector.load %arg6[%c0_10, %c0_11] : memref<8x32xf32, #tpu.memory_space<vmem>>, vector<8x32xf32>
      %c0_12 = arith.constant 0 : index
      %c0_13 = arith.constant 0 : index
      %13 = vector.load %arg3[%c0_12, %c0_13] : memref<8x1xf32, #tpu.memory_space<vmem>>, vector<8x1xf32>
      %14 = vector.broadcast %13 : vector<8x1xf32> to vector<8x32xf32>
      %15 = arith.addf %12, %14 : vector<8x32xf32>
      %c0_14 = arith.constant 0 : index
      %c0_15 = arith.constant 0 : index
      %16 = vector.load %arg5[%c0_14, %c0_15] : memref<8x32xf32, #tpu.memory_space<vmem>>, vector<8x32xf32>
      tpu.vector_store %arg5[%c0_14, %c0_15], %15 {strides = array<i32>} : memref<8x32xf32, #tpu.memory_space<vmem>>, vector<8x32xf32>,
    } else {
    }
    return
  }
  func.func @transform_0(%arg0: i32, %arg1: i32) -> (i32, i32) {
    %c0_i32 = arith.constant 0 : i32
    %c0_i32_0 = arith.constant 0 : i32
    return %c0_i32, %arg1 : i32, i32
  }
  func.func @transform_1(%arg0: i32, %arg1: i32) -> (i32, i32) {
    %c0_i32 = arith.constant 0 : i32
    %c0_i32_0 = arith.constant 0 : i32
    %c0_i32_1 = arith.constant 0 : i32
    return %c0_i32, %c0_i32_0 : i32, i32
  }
  func.func @transform_2(%arg0: i32, %arg1: i32) -> (i32, i32) {
    %c0_i32 = arith.constant 0 : i32
    return %arg1, %arg0 : i32, i32
  }
  func.func @transform_3(%arg0: i32, %arg1: i32) -> (i32, i32) {
    %c0_i32 = arith.constant 0 : i32
    %c0_i32_0 = arith.constant 0 : i32
    return %c0_i32, %arg0 : i32, i32
  }
}

</mosaic_0001>

<bundles_post_ra>
// kernel: tpu_custom_call.1
= control target key start
LH: loop header
LB: loop body
LE: loop exit
PB: predicated region body
PF: predicated region fallthrough
CT: control target
= control target key end

     0   :  { %vm19_vm0 = vcmask 261120   ;;  %vm28_vm1 = vcmask 1043456   ;;  %v169_v1 = vmov 0.0   ;;  %vm170_vm2 = vmmov 0   ;;  %s217_s0 = inlined_call_operand.vmem [shape: f32[8,4], index: 0, kind: input, shape index: {}]   ;;  %s218_s1 = inlined_call_operand.vmem [shape: f32[8,1], index: 1, kind: input, shape index: {}]   ;;  %s219_s2 = inlined_call_operand.vmem [shape: f32[4,32], index: 2, kind: input, shape index: {}]   ;;  %s220_s3 = inlined_call_operand.hbm [shape: f32[8,32], index: 3, kind: output, shape index: {}]  }
   0x1   :  { %v23_v0 = vld [vmem:[%s219_s2] sm:$0xf]  ;;  %20 = vst.msk [vmem:[#allocation2] sm:$0xff] %vm19_vm0, %v169_v1  ;;  %135 = vmatprep.subr.mxu0 %v169_v1  ;;  %137 = vmatprep.mubr.msk.f32.mxu0 %vm170_vm2, %v169_v1  ;;  %vm24_vm3 = vcmask 31744  }
   0x2   :  { %v22_v2 = vld [vmem:[%s217_s0] sm:$0xff] }
   0x3   :  { %v109_v3 = vld [vmem:[%s218_s1] sm:$0xff] }
   0x4   :  { %8 = vsyncpa [#allocation4], 0  ;;  %136 = vmatpush3.msk.msra.mxu0 %vm28_vm1, %v23_v0  ;;  %v171_v4 = vmov 0   ;;  %s172_s2 = smov [#allocation3]  }
   0x5   :  { %144 = vset.pattern.permute.xlu0 %v171_v4  ;;  %138 = vmatmul.mubr.msk.f32.vlgmr.msra.gmra.mrb[0].mxu0 %vm24_vm3, %v22_v2  ;;  %s123_s0 = sshll.u32 %s172_s2, 4  ;;  %s124_s0 = int_to_ptr.vmem [resolvable:$true] %s123_s0 }
   0x6   :  { %112 = vperm.xlu0 %144, %v109_v3   ;;  %s145_s1 = scalar_lea.vmem %s124_s0, 128  ;;  %p150_p1 = scmp.lt.s32.totalorder %s124_s0, %s124_s0 }
   0x7   :  { %p146_p0 = scmp.ne.s32.totalorder %s124_s0, %s145_s1  ;;  %p151_p2 = scmp.lt.s32.totalorder %s145_s1, %s145_s1 }
   0x8   :  { %v21_v5 = vld [vmem:[#allocation2] sm:$0xff] }
   0x9   :  { %p152_p3 = por %p151_p2, %p150_p1 }
   0xb   :  { %p153_p4 = pnand %p152_p3, %p146_p0 }
  0x85   :  { %v113_v9 = vpop.permute.xlu0 %112 }
  0xd8   :  { %v98_v6 = vpop.f32.mrb[0].mxu0 }
  0xd9   :  { %v102_v7 = vadd.f32 %v98_v6, %v21_v5  ;;  %v139_v8 = vpop.f32.mrb[1].mxu0 }
  0xdb   :  { %104 = vst.msk [vmem:[#allocation2] sm:$0xff] %vm19_vm0, %v102_v7 }
  0xe2   :  { %v108_v10 = vld [vmem:[#allocation2] sm:$0xff] }
  0xe3   :  { %v115_v11 = vadd.f32 %v113_v9, %v108_v10 }
  0xe5   :  { %116 = vst.msk [vmem:[#allocation3] sm:$0xff] %vm19_vm0, %v115_v11 }
  0xe6   :  { %156 = shalt.err (!%p153_p4)
}
  0xe7   :  { %s157_s20 = scalar_lea.hbm %s220_s3, 128 }
  0xe8   :  { %p158_p5 = scmp.ne.s32.totalorder %s220_s3, %s157_s20  ;;  %p161_p6 = scmp.lt.u32.totalorder %s157_s20, %s220_s3 }
  0xea   :  { %p163_p7 = pnand %p161_p6, %p158_p5 }
  0xec   :  { %166 = shalt.err (!%p163_p7)
}
  0xed   :  { %126 = dma.vmem_to_hbm [thread:$0]  %s124_s0, 128, %s220_s3, [#allocation4]  }
  0xee   :  { %167 = dma.done.wait [#allocation4], 128  }
  0xef   :  { %168 = vsyncadd [#allocation4], 4294967168 }
  0xf0   :  { %130 = vsyncpa [#allocation4], 1 }

// kernel: tpu_custom_call.1
= control target key start
LH: loop header
LB: loop body
LE: loop exit
PB: predicated region body
PF: predicated region fallthrough
CT: control target
= control target key end

     0   :  { %vm19_vm0 = vcmask 261120   ;;  %vm28_vm1 = vcmask 1043456   ;;  %v169_v1 = vmov 0.0   ;;  %vm170_vm2 = vmmov 0   ;;  %s217_s0 = inlined_call_operand.vmem [shape: f32[8,4], index: 0, kind: input, shape index: {}]   ;;  %s218_s1 = inlined_call_operand.vmem [shape: f32[8,1], index: 1, kind: input, shape index: {}]   ;;  %s219_s2 = inlined_call_operand.vmem [shape: f32[4,32], index: 2, kind: input, shape index: {}]   ;;  %s220_s3 = inlined_call_operand.hbm [shape: f32[8,32], index: 3, kind: output, shape index: {}]  }
   0x1   :  { %v23_v0 = vld [vmem:[%s219_s2] sm:$0xf]  ;;  %20 = vst.msk [vmem:[#allocation2] sm:$0xff] %vm19_vm0, %v169_v1  ;;  %135 = vmatprep.subr.mxu0 %v169_v1  ;;  %137 = vmatprep.mubr.msk.f32.mxu0 %vm170_vm2, %v169_v1  ;;  %vm24_vm3 = vcmask 31744  }
   0x2   :  { %v22_v2 = vld [vmem:[%s217_s0] sm:$0xff] }
   0x3   :  { %v109_v3 = vld [vmem:[%s218_s1] sm:$0xff] }
   0x4   :  { %8 = vsyncpa [#allocation4], 0  ;;  %136 = vmatpush3.msk.msra.mxu0 %vm28_vm1, %v23_v0  ;;  %v171_v4 = vmov 0   ;;  %s172_s2 = smov [#allocation3]  }
   0x5   :  { %144 = vset.pattern.permute.xlu0 %v171_v4  ;;  %138 = vmatmul.mubr.msk.f32.vlgmr.msra.gmra.mrb[0].mxu0 %vm24_vm3, %v22_v2  ;;  %s123_s0 = sshll.u32 %s172_s2, 4  ;;  %s124_s0 = int_to_ptr.vmem [resolvable:$true] %s123_s0 }
   0x6   :  { %112 = vperm.xlu0 %144, %v109_v3   ;;  %s145_s1 = scalar_lea.vmem %s124_s0, 128  ;;  %p150_p1 = scmp.lt.s32.totalorder %s124_s0, %s124_s0 }
   0x7   :  { %p146_p0 = scmp.ne.s32.totalorder %s124_s0, %s145_s1  ;;  %p151_p2 = scmp.lt.s32.totalorder %s145_s1, %s145_s1 }
   0x8   :  { %v21_v5 = vld [vmem:[#allocation2] sm:$0xff] }
   0x9   :  { %p152_p3 = por %p151_p2, %p150_p1 }
   0xb   :  { %p153_p4 = pnand %p152_p3, %p146_p0 }
  0x85   :  { %v113_v9 = vpop.permute.xlu0 %112 }
  0xd8   :  { %v98_v6 = vpop.f32.mrb[0].mxu0 }
  0xd9   :  { %v102_v7 = vadd.f32 %v98_v6, %v21_v5  ;;  %v139_v8 = vpop.f32.mrb[1].mxu0 }
  0xdb   :  { %104 = vst.msk [vmem:[#allocation2] sm:$0xff] %vm19_vm0, %v102_v7 }
  0xe2   :  { %v108_v10 = vld [vmem:[#allocation2] sm:$0xff] }
  0xe3   :  { %v115_v11 = vadd.f32 %v113_v9, %v108_v10 }
  0xe5   :  { %116 = vst.msk [vmem:[#allocation3] sm:$0xff] %vm19_vm0, %v115_v11 }
  0xe6   :  { %156 = shalt.err (!%p153_p4)
}
  0xe7   :  { %s157_s20 = scalar_lea.hbm %s220_s3, 128 }
  0xe8   :  { %p158_p5 = scmp.ne.s32.totalorder %s220_s3, %s157_s20  ;;  %p161_p6 = scmp.lt.u32.totalorder %s157_s20, %s220_s3 }
  0xea   :  { %p163_p7 = pnand %p161_p6, %p158_p5 }
  0xec   :  { %166 = shalt.err (!%p163_p7)
}
  0xed   :  { %126 = dma.vmem_to_hbm [thread:$0]  %s124_s0, 128, %s220_s3, [#allocation4]  }
  0xee   :  { %167 = dma.done.wait [#allocation4], 128  }
  0xef   :  { %168 = vsyncadd [#allocation4], 4294967168 }
  0xf0   :  { %130 = vsyncpa [#allocation4], 1 }

</bundles_post_ra>
